<compile_context>
chip_gen: v7x
topology: tpu7x:2x2x1
jax: 0.10.0
libtpu: 0.0.40
codegen_flags: <defaults>
</compile_context>

<pallas_src>
import jax
import jax.numpy as jnp
from jax.experimental import pallas as pl
from jax.experimental.pallas import tpu as pltpu


def _round_up(x, m):
    return ((x + m - 1) // m) * m


def _sublane(itemsize):
    # sublane packing factor by dtype width (f32 -> 8, bf16 -> 16, int8 -> 32)
    return {4: 8, 2: 16, 1: 32}.get(itemsize, 8)


def _select_tiles(B, C, HW, itemsize, block_budget_bytes, total_vmem_budget_bytes):
    """Pick (tile_b, tile_hw) for the flattened (B, C, HW) layout."""
    c_pad = _round_up(C, _sublane(itemsize))  # real sublane footprint of C

    # Lane tile: multiple of 128 (or the full HW extent, which is always a
    # legal block dim), sized so a single-batch sublane-padded input block
    # stays within the per-block budget.
    max_tile_hw = max(128, (block_budget_bytes // (c_pad * itemsize)) // 128 * 128)
    tile_hw = HW if HW <= max_tile_hw else max_tile_hw
    num_hw_tiles = pl.cdiv(HW, tile_hw)

    # Batch tile: largest divisor of B keeping the padded input block within
    # the per-block budget (packs small feature maps to amortize step cost).
    per_batch = c_pad * tile_hw * itemsize
    max_tile_b = max(1, block_budget_bytes // per_batch)
    tile_b = 1
    for d in range(1, B + 1):
        if B % d == 0 and d <= max_tile_b:
            tile_b = d

    # Clamp against total pipeline VMEM: double-buffered in+out blocks plus
    # ~3 f32 (TILE_B, TILE_HW) temporaries (logits / attn / per-channel cast).
    def vmem_estimate(tb):
        io_block = tb * c_pad * tile_hw * itemsize
        return 4 * io_block + 3 * tb * tile_hw * 4

    while tile_b > 1 and vmem_estimate(tile_b) > total_vmem_budget_bytes:
        tile_b -= 1
        while tile_b > 1 and B % tile_b != 0:
            tile_b -= 1

    # Megacore / 2-TC guard: keep at least 2 grid steps whenever there is
    # work to split (otherwise one TensorCore idles on v7x).
    if num_hw_tiles * (B // tile_b) < 2:
        if B >= 2:
            for d in range(B // 2, 0, -1):
                if B % d == 0:
                    tile_b = d
                    break
        elif HW >= 256:
            tile_hw = _round_up(pl.cdiv(HW, 2), 128)

    return tile_b, tile_hw


def _sse_kernel(x_ref, w_ref, b_ref, o_ref):
    # x_ref : (TB, C, THW)  feature tile, input dtype, VMEM
    # w_ref : (C,)          f32 attention_fc weight, SMEM (scalar splats)
    # b_ref : (1, THW)      f32 spatial bias tile (flattened (h, w)), VMEM
    # o_ref : (TB, C, THW)
    x = x_ref[...]
    C = x.shape[1]
    # f32 channel reduction: SMEM scalar splat * VPU multiply-add, unrolled
    # over C.  No (TB, C, THW) f32 temporary, no cross-sublane reduce.
    logits = x[:, 0, :].astype(jnp.float32) * w_ref[0] + b_ref[...]
    for c in range(1, C):
        logits = logits + x[:, c, :].astype(jnp.float32) * w_ref[c]
    attn = jax.nn.sigmoid(logits)                                  # (TB, THW) f32, EUP
    # Final broadcast multiply in the input dtype (bf16 stays bf16 here).
    o_ref[...] = (x * attn[:, None, :].astype(x.dtype)).astype(o_ref.dtype)


def sse_block(inputs, weight, bias, *,
              block_budget_bytes=4 << 20,
              total_vmem_budget_bytes=32 << 20):
    """sSEBlock forward.  inputs: (B, C, H, W); weight: (C,); bias: (H, W)."""
    B, C, H, W = inputs.shape
    HW = H * W
    itemsize = jnp.dtype(inputs.dtype).itemsize

    tile_b, tile_hw = _select_tiles(B, C, HW, itemsize,
                                    block_budget_bytes, total_vmem_budget_bytes)
    num_hw_tiles = pl.cdiv(HW, tile_hw)
    num_b_tiles = B // tile_b

    x = inputs.reshape(B, C, HW)
    w1 = weight.reshape(-1).astype(jnp.float32)    # (C,)
    b2 = bias.reshape(1, HW).astype(jnp.float32)   # (1, HW)

    # HW tiles outer, batch tiles inner: the bias tile stays resident across
    # all batch steps of a given HW tile (no per-step bias re-fetch).
    grid = (num_hw_tiles, num_b_tiles)

    cost = pl.CostEstimate(
        flops=3 * B * C * HW,
        transcendentals=B * HW,
        bytes_accessed=2 * B * C * HW * itemsize + HW * 4 + C * 4,
    )

    out = pl.pallas_call(
        _sse_kernel,
        out_shape=jax.ShapeDtypeStruct((B, C, HW), inputs.dtype),
        grid_spec=pltpu.PrefetchScalarGridSpec(
            num_scalar_prefetch=0,
            grid=grid,
            in_specs=[
                pl.BlockSpec((tile_b, C, tile_hw), lambda ti, bi: (bi, 0, ti)),
                pl.BlockSpec(memory_space=pltpu.MemorySpace.SMEM),
                pl.BlockSpec((1, tile_hw), lambda ti, bi: (0, ti)),
            ],
            out_specs=pl.BlockSpec((tile_b, C, tile_hw), lambda ti, bi: (bi, 0, ti)),
        ),
        compiler_params=pltpu.CompilerParams(
            dimension_semantics=("parallel", "parallel"),
            vmem_limit_bytes=48 * 1024 * 1024,
        ),
        cost_estimate=cost,
    )(x, w1, b2)

    return out.reshape(B, C, H, W)


def init_params(key, c, h, w):
    # nn.Linear(c, 1, bias=False) initialized with orthogonal_(gain=1):
    # for a (1, c) matrix that is just a unit-norm row vector.
    (kw,) = jax.random.split(key, 1)
    wvec = jax.random.normal(kw, (c,), dtype=jnp.float32)
    wvec = wvec / jnp.linalg.norm(wvec)
    # self.bias = zeros((1, h, w, 1))
    bias = jnp.zeros((h, w), dtype=jnp.float32)
    return wvec, bias


def sse_block_ref(inputs, weight, bias):
    # Pure-JAX reference mirroring the PyTorch forward.
    x = jnp.transpose(inputs, (0, 2, 3, 1))                      # (B, H, W, C)
    logits = jnp.einsum("bhwc,c->bhw", x, weight) + bias[None]   # (B, H, W)
    attn = jax.nn.sigmoid(logits)[:, None, :, :]                 # (B, 1, H, W)
    return inputs * attn


if __name__ == "__main__":
    key = jax.random.PRNGKey(0)
    keys = jax.random.split(key, 8)
    k_in, k_par, k_in2, k_par2, k_b2, k_in3, k_par3, k_b3 = keys

    # Primary small test case (128-aligned HW = 256).
    B, C, H, W = 2, 4, 16, 16
    x = jax.random.normal(k_in, (B, C, H, W), dtype=jnp.float32)
    weight, bias = init_params(k_par, C, H, W)
    out = jax.block_until_ready(sse_block(x, weight, bias))
    ref = sse_block_ref(x, weight, bias)
    assert out.shape == (B, C, H, W)
    assert jnp.allclose(out, ref, atol=1e-5, rtol=1e-5)

    # Non-128-multiple HW (14x14 = 196), random bias to exercise the bias add.
    B2, C2, H2, W2 = 3, 8, 14, 14
    x2 = jax.random.normal(k_in2, (B2, C2, H2, W2), dtype=jnp.float32)
    weight2, _ = init_params(k_par2, C2, H2, W2)
    bias2 = 0.1 * jax.random.normal(k_b2, (H2, W2), dtype=jnp.float32)
    out2 = jax.block_until_ready(sse_block(x2, weight2, bias2))
    ref2 = sse_block_ref(x2, weight2, bias2)
    assert out2.shape == (B2, C2, H2, W2)
    assert jnp.allclose(out2, ref2, atol=1e-5, rtol=1e-5)

    # Force a tiny block budget so the HW axis (10x20 = 200) is split into
    # multiple 128-lane tiles with a masked partial edge block.
    B3, C3, H3, W3 = 2, 4, 10, 20
    x3 = jax.random.normal(k_in3, (B3, C3, H3, W3), dtype=jnp.float32)
    weight3, _ = init_params(k_par3, C3, H3, W3)
    bias3 = 0.1 * jax.random.normal(k_b3, (H3, W3), dtype=jnp.float32)
    out3 = jax.block_until_ready(
        sse_block(x3, weight3, bias3, block_budget_bytes=128 * 8 * 4))
    ref3 = sse_block_ref(x3, weight3, bias3)
    assert out3.shape == (B3, C3, H3, W3)
    assert jnp.allclose(out3, ref3, atol=1e-5, rtol=1e-5)

    print("KERNEL_OK")
</pallas_src>

<mosaic_0001>
module attributes {stable_mosaic.version = 11 : i64} {
  func.func @_sse_kernel(%arg0: i32, %arg1: i32, %arg2: memref<1x4x256xf32, #tpu.memory_space<vmem>>, %arg3: memref<4xf32, #tpu.memory_space<smem>>, %arg4: memref<1x256xf32, #tpu.memory_space<vmem>>, %arg5: memref<1x4x256xf32, #tpu.memory_space<vmem>>) attributes {dimension_semantics = [#tpu.dimension_semantics<parallel>, #tpu.dimension_semantics<parallel>], iteration_bounds = array<i64: 1, 2>, scalar_prefetch = 0 : i64, scratch_operands = 0 : i64, tpu.core_type = #tpu.core_type<tc>, window_params = [{transform_indices = @transform_0, window_bounds = array<i64: 1, 4, 256>}, {transform_indices = @transform_1, window_bounds = array<i64: 4>}, {transform_indices = @transform_2, window_bounds = array<i64: 1, 256>}, {transform_indices = @transform_3, window_bounds = array<i64: 1, 4, 256>}]} {
    %c0 = arith.constant 0 : index
    %c0_0 = arith.constant 0 : index
    %c0_1 = arith.constant 0 : index
    %0 = vector.load %arg2[%c0, %c0_0, %c0_1] : memref<1x4x256xf32, #tpu.memory_space<vmem>>, vector<1x4x256xf32>
    %1 = vector.extract_strided_slice %0 {offsets = [0, 0, 0], sizes = [1, 1, 256], strides = [1, 1, 1]} : vector<1x4x256xf32> to vector<1x1x256xf32>
    %2 = vector.shape_cast %1 : vector<1x1x256xf32> to vector<1x256xf32>
    %c0_2 = arith.constant 0 : index
    %3 = memref.load %arg3[%c0_2] : memref<4xf32, #tpu.memory_space<smem>>
    %4 = vector.broadcast %3 : f32 to vector<1x256xf32>
    %5 = arith.mulf %2, %4 : vector<1x256xf32>
    %c0_3 = arith.constant 0 : index
    %c0_4 = arith.constant 0 : index
    %6 = vector.load %arg4[%c0_3, %c0_4] : memref<1x256xf32, #tpu.memory_space<vmem>>, vector<1x256xf32>
    %7 = arith.addf %5, %6 : vector<1x256xf32>
    %8 = vector.extract_strided_slice %0 {offsets = [0, 1, 0], sizes = [1, 1, 256], strides = [1, 1, 1]} : vector<1x4x256xf32> to vector<1x1x256xf32>
    %9 = vector.shape_cast %8 : vector<1x1x256xf32> to vector<1x256xf32>
    %c1 = arith.constant 1 : index
    %10 = memref.load %arg3[%c1] : memref<4xf32, #tpu.memory_space<smem>>
    %11 = vector.broadcast %10 : f32 to vector<1x256xf32>
    %12 = arith.mulf %9, %11 : vector<1x256xf32>
    %13 = arith.addf %7, %12 : vector<1x256xf32>
    %14 = vector.extract_strided_slice %0 {offsets = [0, 2, 0], sizes = [1, 1, 256], strides = [1, 1, 1]} : vector<1x4x256xf32> to vector<1x1x256xf32>
    %15 = vector.shape_cast %14 : vector<1x1x256xf32> to vector<1x256xf32>
    %c2 = arith.constant 2 : index
    %16 = memref.load %arg3[%c2] : memref<4xf32, #tpu.memory_space<smem>>
    %17 = vector.broadcast %16 : f32 to vector<1x256xf32>
    %18 = arith.mulf %15, %17 : vector<1x256xf32>
    %19 = arith.addf %13, %18 : vector<1x256xf32>
    %20 = vector.extract_strided_slice %0 {offsets = [0, 3, 0], sizes = [1, 1, 256], strides = [1, 1, 1]} : vector<1x4x256xf32> to vector<1x1x256xf32>
    %21 = vector.shape_cast %20 : vector<1x1x256xf32> to vector<1x256xf32>
    %c3 = arith.constant 3 : index
    %22 = memref.load %arg3[%c3] : memref<4xf32, #tpu.memory_space<smem>>
    %23 = vector.broadcast %22 : f32 to vector<1x256xf32>
    %24 = arith.mulf %21, %23 : vector<1x256xf32>
    %25 = arith.addf %19, %24 : vector<1x256xf32>
    %26 = arith.negf %25 : vector<1x256xf32>
    %27 = math.exp %26 : vector<1x256xf32>
    %cst = arith.constant 1.000000e+00 : f32
    %28 = vector.broadcast %cst : f32 to vector<1x256xf32>
    %29 = arith.addf %28, %27 : vector<1x256xf32>
    %30 = arith.divf %28, %29 : vector<1x256xf32>
    %31 = vector.shape_cast %30 : vector<1x256xf32> to vector<1x1x256xf32>
    %32 = vector.broadcast %31 : vector<1x1x256xf32> to vector<1x4x256xf32>
    %33 = arith.mulf %0, %32 : vector<1x4x256xf32>
    %c0_5 = arith.constant 0 : index
    %c0_6 = arith.constant 0 : index
    %c0_7 = arith.constant 0 : index
    %34 = vector.load %arg5[%c0_5, %c0_6, %c0_7] : memref<1x4x256xf32, #tpu.memory_space<vmem>>, vector<1x4x256xf32>
    tpu.vector_store %arg5[%c0_5, %c0_6, %c0_7], %33 {strides = array<i32>} : memref<1x4x256xf32, #tpu.memory_space<vmem>>, vector<1x4x256xf32>,
    return
  }
  func.func @transform_0(%arg0: i32, %arg1: i32) -> (i32, i32, i32) {
    %c0_i32 = arith.constant 0 : i32
    %c0_i32_0 = arith.constant 0 : i32
    return %arg1, %c0_i32, %arg0 : i32, i32, i32
  }
  func.func @transform_1(%arg0: i32, %arg1: i32) -> i32 {
    %c0_i32 = arith.constant 0 : i32
    %c0_i32_0 = arith.constant 0 : i32
    return %c0_i32 : i32
  }
  func.func @transform_2(%arg0: i32, %arg1: i32) -> (i32, i32) {
    %c0_i32 = arith.constant 0 : i32
    %c0_i32_0 = arith.constant 0 : i32
    return %c0_i32, %arg0 : i32, i32
  }
  func.func @transform_3(%arg0: i32, %arg1: i32) -> (i32, i32, i32) {
    %c0_i32 = arith.constant 0 : i32
    %c0_i32_0 = arith.constant 0 : i32
    return %arg1, %c0_i32, %arg0 : i32, i32, i32
  }
}

</mosaic_0001>

<bundles_post_ra>
// kernel: tpu_custom_call.1
= control target key start
LH: loop header
LB: loop body
LE: loop exit
PB: predicated region body
PF: predicated region fallthrough
CT: control target
= control target key end

     0   :  { %8 = vsyncpa [#allocation3], 0  ;;  %s903_s0 = inlined_call_operand.hbm [shape: f32[2,4,256], index: 0, kind: input, shape index: {}]   ;;  %s904_s1 = inlined_call_operand.vmem [shape: f32[4], index: 1, kind: input, shape index: {}]   ;;  %s905_s2 = inlined_call_operand.vmem [shape: f32[1,256], index: 2, kind: input, shape index: {}]   ;;  %s906_s3 = inlined_call_operand.hbm [shape: f32[2,4,256], index: 3, kind: output, shape index: {}]  }
   0x1   :  { %10 = vsyncpa [#allocation3 + $0x1], 0 }
   0x2   :  { %11 = vsyncpa [#allocation5], 0 }
   0x3   :  { %12 = vsyncpa [#allocation4], 0 }
   0x4   :  { %14 = vsyncpa [#allocation4 + $0x1], 0  ;;  %s697_s12 = smov 0   ;;  %s699_s13 = smov 0  }
   0x5   :  { %s701_s14 = smov 0   ;;  %s703_s15 = smov 0  }
   0x6   :  { %s705_s16 = smov 0   ;;  %s707_s17 = smov 0  }
   0x7 LB: > { %s435_s18 = sadd.s32 4294967295, %s671_s17   ;;  %s436_s19 = sadd.s32 4294967294, %s671_s17   ;;  %s671_s17 = sphi %s707_s17, %s20_s17   ;;  %s667_s16 = sphi %s705_s16, %s928_s16   ;;  %s663_s15 = sphi %s703_s15, %s927_s15   ;;  %s659_s14 = sphi %s701_s14, %s926_s14   ;;  %s655_s13 = sphi %s699_s13, %s925_s13   ;;  %s651_s12 = sphi %s697_s12, %s924_s12  }
   0x8   : > { %p54_p0 = scmp.ne.s32.totalorder %s655_s13, %s651_s12  ;;  %p731_p1 = scmp.eq.s32.totalorder %s435_s18, 0 }
   0x9   : > { %p735_p2 = scmp.eq.s32.totalorder %s435_s18, 1  ;;  %p133_p3 = scmp.eq.s32.totalorder %s436_s19, 1 }
   0xa   : > { %s911_s20 = scalar_select %p731_p1, 1, 0 }
   0xb   : > { %p741_p4 = por %p731_p1, %p54_p0  ;;  %p437_p5 = scmp.ge.s32.totalorder %s671_s17, 1 }
   0xc   : > { %p746_p6 = por %p133_p3, %p54_p0  ;;  %p140_p7 = scmp.lt.s32.totalorder %s671_s17, 3 }
   0xd   : > { %s913_s22 = scalar_select %p741_p4, 1, 0 }
   0xe   : > { %s914_s23 = scalar_select %p746_p6, 1, 0 }
   0xf   : > { %s153_s26 = sshll.u32 %s904_s1, 4  ;;  %p754_p8 = pnand %p437_p5, %p140_p7  ;;  %s154_s26 = int_to_ptr.vmem [resolvable:$true] %s153_s26 }
  0x10   : > { %s29_s29 = sadd.s32 1, %s667_s16  ;;  %s41_s30 = sadd.s32 1, %s659_s14 }
  0x11   : > { %p470_p10 = pneg %p754_p8  ;;  %p30_p12 = scmp.ge.s32.totalorder %s29_s29, 2 }
  0x12   : > { %s540_s4 = scalar_lea.vmem %s154_s26, 16  ;;  %p548_p7 = scmp.lt.s32.totalorder %s154_s26, %s154_s26 }
  0x13   : > { %p763_p11 = pnand %p470_p10, %p731_p1  ;;  %p541_p13 = scmp.ne.s32.totalorder %s154_s26, %s540_s4 }
  0x14   : > { %p549_p6 = scmp.lt.s32.totalorder %s540_s4, %s540_s4 }
  0x15   : > { %p542_p0 = pneg %p763_p11 }
  0x16   : > { %p550_p9 = por %p549_p6, %p548_p7 }
  0x17   : > { %p543_p3 = pnand %p542_p0, %p541_p13 }
  0x19   : > { %p544_p5 = pneg %p543_p3 }
  0x1b   : > { %p551_p4 = pnand %p550_p9, %p544_p5 }
  0x1d   : > { %554 = shalt.err (!%p551_p4)
}
  0x1e   : > { %s673_s5 = smov [#allocation6]   ;;  %s930_s29 = smov (%p30_p12, %s29_s29), 0 }
  0x1f   : > { %473 = dma.vmem_to_smem (!%p763_p11), %s154_s26, 16, %s673_s5, [#allocation5]  }
  0x20   : > { %p48_p10 = scmp.ne.s32.totalorder %s659_s14, %s655_s13  ;;  %p49_p6 = scmp.eq.s32.totalorder %s671_s17, 0 }
  0x21   : > { %s36_s6 = ssub.s32 %s667_s16, %s930_s29  ;;  %p483_p4 = scmp.lt.s32.totalorder %s671_s17, 2 }
  0x22   : > { %p39_p9 = scmp.eq.s32.totalorder %s36_s6, 0  ;;  %p50_p13 = por %p49_p6, %p48_p10 }
  0x23   : > { %p783_p0 = por %p735_p2, %p48_p10  ;;  %s172_s8 = sand.u32 1, %s659_s14  }
  0x24   : > { %s789_s9 = scalar_select %p39_p9, %s659_s14, %s41_s30  }
  0x25   : > { %s917_s7 = scalar_select %p783_p0, 1, 0 }
  0x26   : > { %s441_s10 = sshll.u32 %s172_s8, 3  ;;  %s460_s11 = sshll.u32 %s667_s16, 7 }
  0x27   : > { %s795_s24 = scalar_lea.hbm %s903_s0, %s460_s11  ;;  %s176_s25 = scalar_lea.vmem [#allocation2], %s441_s10 }
  0x28   : > { %s186_s21 = sshll.u32 %s176_s25, 4  ;;  %p799_p2 = pnand %p483_p4, %p50_p13  ;;  %s797_s21 = int_to_ptr.vmem [resolvable:$true] %s186_s21 }
  0x29   : > { %s173_s28 = scalar_lea.sflag [#allocation3], %s172_s8  ;;  %s555_s30 = scalar_lea.hbm %s795_s24, 128 }
  0x2a   : > { %p556_p11 = scmp.ne.s32.totalorder %s795_s24, %s555_s30  ;;  %p557_p12 = pneg %p799_p2 }
  0x2b   : > { %s560_s6 = scalar_lea.hbm %s903_s0, 256  ;;  %p561_p7 = scmp.lt.u32.totalorder %s795_s24, %s903_s0 }
  0x2c   : > { %p558_p3 = pnand %p557_p12, %p556_p11  ;;  %p562_p10 = scmp.lt.u32.totalorder %s560_s6, %s555_s30 }
  0x2d   : > { %p564_p4 = scmp.lt.u32.totalorder %s555_s30, %s795_s24 }
  0x2e   : > { %p559_p5 = pneg %p558_p3  ;;  %p563_p6 = por %p562_p10, %p561_p7 }
  0x30   : > { %p565_p9 = por %p564_p4, %p563_p6 }
  0x32   : > { %p566_p13 = pnand %p565_p9, %p559_p5 }
  0x34   : > { %569 = shalt.err (!%p566_p13)
}
  0x35   : > { %s570_s8 = scalar_lea.vmem %s797_s21, 128  ;;  %s674_s18 = smov [#allocation2]  }
  0x36   : > { %p571_p11 = scmp.ne.s32.totalorder %s797_s21, %s570_s8  ;;  %s575_s19 = sshll.u32 %s674_s18, 4  ;;  %s576_s19 = int_to_ptr.vmem [resolvable:$false] %s575_s19 }
  0x37   : > { %s577_s25 = scalar_lea.vmem %s576_s19, 256  ;;  %p578_p1 = scmp.lt.s32.totalorder %s797_s21, %s576_s19 }
  0x38   : > { %p573_p3 = pnand %p571_p11, %p557_p12  ;;  %p579_p7 = scmp.lt.s32.totalorder %s577_s25, %s570_s8 }
  0x3a   : > { %p574_p0 = pneg %p573_p3  ;;  %p580_p10 = por %p579_p7, %p578_p1 }
  0x3c   : > { %p581_p6 = pnand %p580_p10, %p574_p0 }
  0x3e   : > { %584 = shalt.err (!%p581_p6)
}
  0x3f   : > { %477 = dma.hbm_to_vmem [thread:$0]  (!%p799_p2), %s795_s24, 128, %s797_s21, %s173_s28  }
  0x40   : > { %195 = sbr.rel (%p754_p8) target bundleno = 142 (0x8e), region = 32  ;;  %s831_s30 = sand.u32 (!%p754_p8), 1, %s655_s13  }
  0x41   : > { %s445_s4 = sshll.u32 (!%p754_p8), %s831_s30, 3  ;;  %s198_s5 = scalar_lea.sflag (!%p754_p8), [#allocation3], %s831_s30 }
  0x42   : > { %s201_s6 = scalar_lea.vmem (!%p754_p8), [#allocation2], %s445_s4  ;;  %p919_p1 = scmp.ne.s32.totalorder (!%p754_p8), %s913_s22, 0 }
  0x47   : > { %638 = dma.done.wait (%p919_p1), %s198_s5, 128  }
  0x48   : > { %640 = vsyncadd (%p919_p1), %s198_s5, 4294967168  ;;  %p920_p0 = scmp.ne.s32.totalorder %s911_s20, 0 }
  0x4a   : > { %642 = dma.done.wait (%p920_p0), [#allocation5], 16  }
  0x4b   : > { %644 = vsyncadd (%p920_p0), [#allocation5], 4294967280 }
  0x4c   : > { %210 = sfence }
  0x4d   : > { %s241_s27 = sld [smem:[#allocation6]]  ;;  %v249_v0 = vlaneseq  ;;  %s448_s24 = sld [smem:[#allocation6 + $0x1]]  ;;  %v675_v1 = vmov 286326784   ;;  %v240_v4 = vld [vmem:[%s201_s6] sm:$0xff] }
  0x4e   : > { %s450_s21 = sld [smem:[#allocation6 + $0x2]]  ;;  %v247_v2 = vunpack.c.l.s4 %v675_v1  ;;  %s452_s26 = sld [smem:[#allocation6 + $0x3]]  ;;  %v244_v6 = vld [vmem:[%s905_s2] sm:$0x3] }
  0x4f   : > { %v250_v3 = vshrl.u32 %v249_v0, 7  ;;  %s232_s20 = scalar_lea.vmem [#allocation7], %s445_s4  ;;  %s461_s11 = sshll.u32 %s663_s15, 7 }
  0x50   : > { %v248_v5 = vunpack.c.0.s8 %v247_v2  ;;  %s327_s10 = sshll.u32 %s232_s20, 4  ;;  %s856_s19 = scalar_lea.hbm %s906_s3, %s461_s11  ;;  %s851_s10 = int_to_ptr.vmem [resolvable:$true] %s327_s10 }
  0x51   : > { %v288_v27 = vsub.s32 0, %v250_v3  ;;  %v292_v28 = vsub.s32 4, %v250_v3  ;;  %s311_s25 = scalar_lea.sflag [#allocation4], %s831_s30  ;;  %s585_s5 = scalar_lea.vmem %s851_s10, 128 }
  0x52   : > { %v251_v8 = vsub.s32 %v248_v5, %v250_v3  ;;  %p586_p8 = scmp.ne.s32.totalorder %s851_s10, %s585_s5  ;;  %p921_p2 = scmp.ne.s32.totalorder %s917_s7, 0 }
  0x53   : > { %v242_v7 = vstv %s241_s27  ;;  %v256_v10 = vstv %s448_s24  ;;  %s676_s15 = smov [#allocation7]  }
  0x54   : > { %v243_v9 = vmul.f32 %v242_v7, %v240_v4  ;;  %v264_v11 = vstv %s450_s21  ;;  %v252_v12 = vrot.slane %v244_v6, %v251_v8  ;;  %v257_v13 = vmul.f32 %v256_v10, %v240_v4  ;;  %p587_p12 = pnand %p586_p8, %p921_p2  ;;  %s589_s4 = sshll.u32 %s676_s15, 4  ;;  %s590_s4 = int_to_ptr.vmem [resolvable:$false] %s589_s4 }
  0x55   : > { %v265_v14 = vmul.f32 %v264_v11, %v240_v4  ;;  %v272_v15 = vstv %s452_s26  ;;  %s591_s6 = scalar_lea.vmem %s590_s4, 256  ;;  %p592_p4 = scmp.lt.s32.totalorder %s851_s10, %s590_s4 }
  0x56   : > { %v273_v16 = vmul.f32 %v272_v15, %v240_v4  ;;  %v254_v17 = vadd.f32 %v252_v12, %v243_v9  ;;  %v449_v18 = vrot.slane %v257_v13, 9  ;;  %p588_p5 = pneg %p587_p12  ;;  %p593_p9 = scmp.lt.s32.totalorder %s591_s6, %s585_s5 }
  0x57   : > { %v451_v19 = vrot.slane %v265_v14, 10 }
  0x58   : > { %v262_v20 = vadd.f32 %v449_v18, %v254_v17  ;;  %v453_v21 = vrot.slane %v273_v16, 11  ;;  %p594_p13 = por %p593_p9, %p592_p4 }
  0x5a   : > { %v270_v22 = vadd.f32 %v451_v19, %v262_v20  ;;  %p595_p11 = pnand %p594_p13, %p588_p5 }
  0x5c   : > { %v278_v23 = vadd.f32 %v453_v21, %v270_v22 }
  0x5e   : > { %v454_v24 = vmul.f32 -1.442695, %v278_v23 }
  0x60   : > { %536 = vpow2.f32 %v454_v24 }
  0x6a   : > { %v537_v25 = vpop.eup %536 }
  0x6b   : > { %v282_v26 = vadd.f32 1.0, %v537_v25 }
  0x6d   : > { %538 = vrcp.f32 %v282_v26 }
  0x77   : > { %v539_v29 = vpop.eup %538 }
  0x78   : > { %v289_v30 = vrot.slane %v539_v29, %v288_v27  ;;  %v293_v31 = vrot.slane %v539_v29, %v292_v28 }
  0x7a   : > { %v299_v32 = vrot.slane %v289_v30, %v288_v27  ;;  %v303_v33 = vrot.slane %v293_v31, %v288_v27 }
  0x7c   : > { %v306_v34 = vcombine.low %v299_v32, %v303_v33 }
  0x7e   : > { %v308_v35 = vmul.f32 %v306_v34, %v240_v4 }
  0x80   : > { %309 = vst [vmem:[%s232_s20] sm:$0xff] %v308_v35 }
  0x81   : > { %598 = shalt.err (!%p595_p11)
}
  0x82   : > { %s599_s30 = scalar_lea.hbm %s856_s19, 128  ;;  %s603_s21 = scalar_lea.hbm %s906_s3, 256 }
  0x83   : > { %p600_p3 = scmp.ne.s32.totalorder %s856_s19, %s599_s30  ;;  %p604_p6 = scmp.lt.u32.totalorder %s856_s19, %s906_s3 }
  0x84   : > { %p605_p1 = scmp.lt.u32.totalorder %s603_s21, %s599_s30  ;;  %p607_p8 = scmp.lt.u32.totalorder %s599_s30, %s856_s19 }
  0x85   : > { %p601_p7 = pnand %p600_p3, %p921_p2 }
  0x86   : > { %p606_p0 = por %p605_p1, %p604_p6 }
  0x87   : > { %p602_p10 = pneg %p601_p7 }
  0x88   : > { %p608_p12 = por %p607_p8, %p606_p0 }
  0x8a   : > { %p609_p5 = pnand %p608_p12, %p602_p10 }
  0x8c   : > { %612 = shalt.err (!%p609_p5)
}
  0x8d   : > { %468 = dma.vmem_to_hbm [thread:$0]  (%p921_p2), %s851_s10, 128, %s856_s19, %s311_s25  }
  0x8e PF: > { %s339_s22 = sand.u32 1, %s651_s12   ;;  %p922_p4 = scmp.ne.s32.totalorder %s914_s23, 0 }
  0x8f   : > { %p923_p9 = scmp.ge.s32.totalorder %s671_s17, 2  ;;  %s340_s20 = scalar_lea.sflag [#allocation4], %s339_s22 }
  0x91   : > { %p479_p13 = pnand %p923_p9, %p922_p4 }
  0x93   : > { %646 = dma.done.wait (!%p479_p13), %s340_s20, 128  }
  0x94   : > { %648 = vsyncadd (!%p479_p13), %s340_s20, 4294967168  ;;  %s20_s17 = sadd.s32 1, %s671_s17   ;;  %s924_s12 = smov %s655_s13 }
  0x95   : > { %p17_p11 = scmp.ge.s32.totalorder %s20_s17, 4   ;;  %s925_s13 = smov %s659_s14 }
  0x96   : > { %s926_s14 = smov %s789_s9  ;;  %s927_s15 = smov %s667_s16 }
  0x97   : > { %s928_s16 = smov %s930_s29  ;;  %19 = sbr.rel (!%p17_p11) target bundleno = 7 (0x7), region = 85 }
  0x9e   :  { %345 = vsyncpa [#allocation3], 1 }
  0x9f   :  { %347 = vsyncpa [#allocation3 + $0x1], 1 }
  0xa0   :  { %348 = vsyncpa [#allocation4], 1 }
  0xa1   :  { %350 = vsyncpa [#allocation4 + $0x1], 1 }
  0xa2   :  { %351 = vsyncpa [#allocation5], 1 }
  0xa3   :  { %353 = vsyncpa [#allocation5 + $0x1], 1 }

</bundles_post_ra>
